<compile_context>
chip_gen: v5e
topology: v5e:2x2
jax: 0.10.0
libtpu: 0.0.40
codegen_flags: <defaults>
</compile_context>

<pallas_src>
import functools

import jax
import jax.numpy as jnp
from jax.experimental import pallas as pl
from jax.experimental.pallas import tpu as pltpu

_LANE = 128


def _round_up(x, m):
    return (x + m - 1) // m * m


def make_mlp_kernel(num_layers):
    """Fused kernel: num_layers x (matmul + bias [+ ReLU]) on one row tile."""

    def kernel(x_ref, *refs):
        # refs = (w0, b0, w1, b1, ..., w_{L-1}, b_{L-1}, out_ref)
        out_ref = refs[-1]
        params = refs[:-1]
        h = x_ref[...]
        for i in range(num_layers):
            w = params[2 * i][...]
            b = params[2 * i + 1][...]
            # MXU operands in the weights' storage dtype (bf16 recommended);
            # accumulate in f32 via preferred_element_type.
            acc = jnp.dot(h.astype(w.dtype), w,
                          preferred_element_type=jnp.float32)
            acc = acc + b.astype(jnp.float32)
            h = jnp.maximum(acc, 0.0) if i < num_layers - 1 else acc
        out_ref[...] = h.astype(out_ref.dtype)

    return kernel


def _vmem_cap_bytes():
    try:
        return int(pltpu.get_tpu_info().vmem_capacity_bytes)
    except Exception:
        return 128 * 1024 * 1024  # conservative default (v5e/v6e physical)


@functools.partial(jax.jit, static_argnames=("tile_m", "single_buffer_params"))
def _mlp_forward_impl(x, weights, biases, *, tile_m, single_buffer_params):
    num_layers = len(weights)
    M, in_dim = x.shape
    out_dim = weights[-1].shape[1]

    # ---- lane-dense padding: every feature dim -> multiple of 128 ----------
    dims = [in_dim] + [w.shape[1] for w in weights]
    pdims = [_round_up(d, _LANE) for d in dims]

    # ---- row tile: big enough to fill MXU rows and amortize per-step
    # pipeline overhead, never larger than the (padded) row count.  Multiple
    # of 16 so both f32 and bf16 activations are sublane-aligned.
    # On v7x pick tile_m so that M // tile_m >= #TensorCores (megacore).
    tm = max(16, min(tile_m, _round_up(M, 16)))
    tm = _round_up(tm, 16)
    Mp = _round_up(M, tm)

    xp = jnp.pad(x, ((0, Mp - M), (0, pdims[0] - in_dim)))
    wp, bp = [], []
    for i, (w, b) in enumerate(zip(weights, biases)):
        wp.append(jnp.pad(w, ((0, pdims[i] - w.shape[0]),
                              (0, pdims[i + 1] - w.shape[1]))))
        b2 = b.reshape(1, -1)
        bp.append(jnp.pad(b2, ((0, 0), (0, pdims[i + 1] - b2.shape[1]))))

    # Weights/biases are grid-invariant; single-buffer them when supported so
    # their VMEM footprint is 1x instead of 2x (leaves room for big row tiles).
    param_kwargs = {}
    if single_buffer_params:
        param_kwargs = dict(pipeline_mode=pl.Buffered(1))

    in_specs = [pl.BlockSpec((tm, pdims[0]), lambda i: (i, 0))]
    flat_params = []
    for w, b in zip(wp, bp):
        in_specs.append(pl.BlockSpec(w.shape, lambda i: (0, 0), **param_kwargs))
        in_specs.append(pl.BlockSpec(b.shape, lambda i: (0, 0), **param_kwargs))
        flat_params.extend([w, b])
    out_spec = pl.BlockSpec((tm, pdims[-1]), lambda i: (i, 0))

    # ---- explicit VMEM budget: params (+ buffering) + double-buffered x/out
    # row tiles + f32 activation working set, clamped to a chip-aware cap. ----
    param_bufs = 1 if single_buffer_params else 2
    needed = 0
    for w, b in zip(wp, bp):
        needed += param_bufs * (w.size * w.dtype.itemsize +
                                b.size * b.dtype.itemsize)
    needed += 2 * tm * pdims[0] * x.dtype.itemsize     # input row tile (2 bufs)
    needed += 2 * tm * pdims[-1] * x.dtype.itemsize    # output row tile (2 bufs)
    needed += 2 * tm * max(pdims) * 4                  # f32 intermediate acts
    needed = int(needed * 1.3) + (4 << 20)             # headroom
    cap = max(32 << 20, int(0.75 * _vmem_cap_bytes())) # ~48MiB v7x, ~96MiB v5e/v6e
    vmem_limit = min(max(needed, 32 << 20), cap)

    # TODO(synk): for MLPs whose total resident weight bytes exceed ~40 MiB
    # (v7x has only 64 MiB VMEM/TC), add a K/N-tiled fallback that streams
    # weight tiles with an f32 accumulator instead of keeping all weights
    # resident.

    kernel = make_mlp_kernel(num_layers)
    out_padded = pl.pallas_call(
        kernel,
        out_shape=jax.ShapeDtypeStruct((Mp, pdims[-1]), x.dtype),
        grid_spec=pltpu.PrefetchScalarGridSpec(
            num_scalar_prefetch=0,
            grid=(Mp // tm,),
            in_specs=in_specs,
            out_specs=out_spec,
        ),
        compiler_params=pltpu.CompilerParams(
            dimension_semantics=("parallel",),
            vmem_limit_bytes=vmem_limit,
        ),
    )(xp, *flat_params)

    return out_padded[:M, :out_dim]


def mlp_forward(x, weights, biases, *, tile_m=256):
    """Fused MLP forward.

    x:       [M, input_dim]
    weights: list of [in_dim, out_dim] arrays (transposed nn.Linear weights)
    biases:  list of [1, out_dim] (or [out_dim]) arrays
    """
    if getattr(pl, "Buffered", None) is not None:
        try:
            return _mlp_forward_impl(x, weights, biases, tile_m=tile_m,
                                     single_buffer_params=True)
        except Exception:
            # Pallas build without Buffered(1) support on the top-level
            # pipeline: fall back to default double-buffered params.
            pass
    return _mlp_forward_impl(x, weights, biases, tile_m=tile_m,
                             single_buffer_params=False)


def init_mlp_params(key, input_dim, hidden_dim, output_dim, num_layers):
    """Deterministic parameter init matching the PyTorch layer shapes.

    nn.Linear(n, k) has weight [k, n]; we store its transpose [n, k].
    """
    h = [hidden_dim] * (num_layers - 1)
    dims = list(zip([input_dim] + h, h + [output_dim]))
    weights, biases = [], []
    for (n, k) in dims:
        key, kw, kb = jax.random.split(key, 3)
        bound = 1.0 / jnp.sqrt(n)  # mimic PyTorch uniform(-1/sqrt(n), 1/sqrt(n))
        w = jax.random.uniform(kw, (n, k), jnp.float32, minval=-bound, maxval=bound)
        b = jax.random.uniform(kb, (1, k), jnp.float32, minval=-bound, maxval=bound)
        weights.append(w)
        biases.append(b)
    return weights, biases


def mlp_reference(x, weights, biases):
    """Pure-JAX reference for correctness checking."""
    h = x
    L = len(weights)
    for i, (w, b) in enumerate(zip(weights, biases)):
        h = h @ w + b.reshape(-1)
        if i < L - 1:
            h = jnp.maximum(h, 0.0)
    return h


if __name__ == "__main__":
    # Small shapes consistent with the module:
    # MLP(input_dim=16, hidden_dim=32, output_dim=8, num_layers=3) on [64, 16].
    input_dim, hidden_dim, output_dim, num_layers = 16, 32, 8, 3
    M = 64

    key = jax.random.PRNGKey(0)
    key, kx = jax.random.split(key)
    x = jax.random.normal(kx, (M, input_dim), jnp.float32)
    weights, biases = init_mlp_params(key, input_dim, hidden_dim, output_dim,
                                      num_layers)

    # --- f32 path -----------------------------------------------------------
    out = jax.block_until_ready(mlp_forward(x, weights, biases))
    ref = mlp_reference(x, weights, biases)
    assert out.shape == (M, output_dim), out.shape
    assert jnp.allclose(out, ref, atol=1e-4, rtol=1e-4), \
        f"f32 max err {jnp.max(jnp.abs(out - ref))}"

    # --- bf16 operand path (recommended for perf: bf16 into MXU, f32 acc) ----
    x16 = x.astype(jnp.bfloat16)
    w16 = [w.astype(jnp.bfloat16) for w in weights]
    b16 = [b.astype(jnp.bfloat16) for b in biases]
    out16 = jax.block_until_ready(mlp_forward(x16, w16, b16))
    ref16 = mlp_reference(x16.astype(jnp.float32),
                          [w.astype(jnp.float32) for w in w16],
                          [b.astype(jnp.float32) for b in b16])
    assert out16.shape == (M, output_dim), out16.shape
    assert jnp.allclose(out16.astype(jnp.float32), ref16, atol=2e-2, rtol=2e-2), \
        f"bf16 max err {jnp.max(jnp.abs(out16.astype(jnp.float32) - ref16))}"

    print("KERNEL_OK")
</pallas_src>

<mosaic_0001>
module attributes {stable_mosaic.version = 11 : i64} {
  func.func @kernel(%arg0: i32, %arg1: memref<64x128xf32, #tpu.memory_space<vmem>>, %arg2: memref<128x128xf32, #tpu.memory_space<vmem>>, %arg3: memref<1x128xf32, #tpu.memory_space<vmem>>, %arg4: memref<128x128xf32, #tpu.memory_space<vmem>>, %arg5: memref<1x128xf32, #tpu.memory_space<vmem>>, %arg6: memref<128x128xf32, #tpu.memory_space<vmem>>, %arg7: memref<1x128xf32, #tpu.memory_space<vmem>>, %arg8: memref<64x128xf32, #tpu.memory_space<vmem>>) attributes {dimension_semantics = [#tpu.dimension_semantics<parallel>], iteration_bounds = array<i64: 1>, scalar_prefetch = 0 : i64, scratch_operands = 0 : i64, tpu.core_type = #tpu.core_type<tc>, window_params = [{transform_indices = @transform_0, window_bounds = array<i64: 64, 128>}, {pipeline_mode = #tpu.pipeline_mode<synchronous>, transform_indices = @transform_1, window_bounds = array<i64: 128, 128>}, {pipeline_mode = #tpu.pipeline_mode<synchronous>, transform_indices = @transform_2, window_bounds = array<i64: 1, 128>}, {pipeline_mode = #tpu.pipeline_mode<synchronous>, transform_indices = @transform_3, window_bounds = array<i64: 128, 128>}, {pipeline_mode = #tpu.pipeline_mode<synchronous>, transform_indices = @transform_4, window_bounds = array<i64: 1, 128>}, {pipeline_mode = #tpu.pipeline_mode<synchronous>, transform_indices = @transform_5, window_bounds = array<i64: 128, 128>}, {pipeline_mode = #tpu.pipeline_mode<synchronous>, transform_indices = @transform_6, window_bounds = array<i64: 1, 128>}, {transform_indices = @transform_7, window_bounds = array<i64: 64, 128>}]} {
    %c0 = arith.constant 0 : index
    %c0_0 = arith.constant 0 : index
    %0 = vector.load %arg1[%c0, %c0_0] : memref<64x128xf32, #tpu.memory_space<vmem>>, vector<64x128xf32>
    %c0_1 = arith.constant 0 : index
    %c0_2 = arith.constant 0 : index
    %1 = vector.load %arg2[%c0_1, %c0_2] : memref<128x128xf32, #tpu.memory_space<vmem>>, vector<128x128xf32>
    %c0_3 = arith.constant 0 : index
    %c0_4 = arith.constant 0 : index
    %2 = vector.load %arg3[%c0_3, %c0_4] : memref<1x128xf32, #tpu.memory_space<vmem>>, vector<1x128xf32>
    %cst = arith.constant dense<0.000000e+00> : vector<64x128xf32>
    %3 = tpu.matmul %0, %1, %cst {dimension_numbers = #tpu.dot_dimension_numbers<[1], [0], [0], [1], [0, 0, 1, 1], [], []>} : vector<64x128xf32>, vector<128x128xf32>, vector<64x128xf32> -> vector<64x128xf32>
    %4 = vector.broadcast %2 : vector<1x128xf32> to vector<64x128xf32>
    %5 = arith.addf %3, %4 : vector<64x128xf32>
    %cst_5 = arith.constant 0.000000e+00 : f32
    %6 = vector.broadcast %cst_5 : f32 to vector<64x128xf32>
    %7 = arith.maximumf %5, %6 : vector<64x128xf32>
    %c0_6 = arith.constant 0 : index
    %c0_7 = arith.constant 0 : index
    %8 = vector.load %arg4[%c0_6, %c0_7] : memref<128x128xf32, #tpu.memory_space<vmem>>, vector<128x128xf32>
    %c0_8 = arith.constant 0 : index
    %c0_9 = arith.constant 0 : index
    %9 = vector.load %arg5[%c0_8, %c0_9] : memref<1x128xf32, #tpu.memory_space<vmem>>, vector<1x128xf32>
    %cst_10 = arith.constant dense<0.000000e+00> : vector<64x128xf32>
    %10 = tpu.matmul %7, %8, %cst_10 {dimension_numbers = #tpu.dot_dimension_numbers<[1], [0], [0], [1], [0, 0, 1, 1], [], []>} : vector<64x128xf32>, vector<128x128xf32>, vector<64x128xf32> -> vector<64x128xf32>
    %11 = vector.broadcast %9 : vector<1x128xf32> to vector<64x128xf32>
    %12 = arith.addf %10, %11 : vector<64x128xf32>
    %cst_11 = arith.constant 0.000000e+00 : f32
    %13 = vector.broadcast %cst_11 : f32 to vector<64x128xf32>
    %14 = arith.maximumf %12, %13 : vector<64x128xf32>
    %c0_12 = arith.constant 0 : index
    %c0_13 = arith.constant 0 : index
    %15 = vector.load %arg6[%c0_12, %c0_13] : memref<128x128xf32, #tpu.memory_space<vmem>>, vector<128x128xf32>
    %c0_14 = arith.constant 0 : index
    %c0_15 = arith.constant 0 : index
    %16 = vector.load %arg7[%c0_14, %c0_15] : memref<1x128xf32, #tpu.memory_space<vmem>>, vector<1x128xf32>
    %cst_16 = arith.constant dense<0.000000e+00> : vector<64x128xf32>
    %17 = tpu.matmul %14, %15, %cst_16 {dimension_numbers = #tpu.dot_dimension_numbers<[1], [0], [0], [1], [0, 0, 1, 1], [], []>} : vector<64x128xf32>, vector<128x128xf32>, vector<64x128xf32> -> vector<64x128xf32>
    %18 = vector.broadcast %16 : vector<1x128xf32> to vector<64x128xf32>
    %19 = arith.addf %17, %18 : vector<64x128xf32>
    %c0_17 = arith.constant 0 : index
    %c0_18 = arith.constant 0 : index
    %20 = vector.load %arg8[%c0_17, %c0_18] : memref<64x128xf32, #tpu.memory_space<vmem>>, vector<64x128xf32>
    tpu.vector_store %arg8[%c0_17, %c0_18], %19 {strides = array<i32>} : memref<64x128xf32, #tpu.memory_space<vmem>>, vector<64x128xf32>,
    return
  }
  func.func @transform_0(%arg0: i32) -> (i32, i32) {
    %c0_i32 = arith.constant 0 : i32
    %c0_i32_0 = arith.constant 0 : i32
    return %arg0, %c0_i32 : i32, i32
  }
  func.func @transform_1(%arg0: i32) -> (i32, i32) {
    %c0_i32 = arith.constant 0 : i32
    %c0_i32_0 = arith.constant 0 : i32
    %c0_i32_1 = arith.constant 0 : i32
    return %c0_i32, %c0_i32_0 : i32, i32
  }
  func.func @transform_2(%arg0: i32) -> (i32, i32) {
    %c0_i32 = arith.constant 0 : i32
    %c0_i32_0 = arith.constant 0 : i32
    %c0_i32_1 = arith.constant 0 : i32
    return %c0_i32, %c0_i32_0 : i32, i32
  }
  func.func @transform_3(%arg0: i32) -> (i32, i32) {
    %c0_i32 = arith.constant 0 : i32
    %c0_i32_0 = arith.constant 0 : i32
    %c0_i32_1 = arith.constant 0 : i32
    return %c0_i32, %c0_i32_0 : i32, i32
  }
  func.func @transform_4(%arg0: i32) -> (i32, i32) {
    %c0_i32 = arith.constant 0 : i32
    %c0_i32_0 = arith.constant 0 : i32
    %c0_i32_1 = arith.constant 0 : i32
    return %c0_i32, %c0_i32_0 : i32, i32
  }
  func.func @transform_5(%arg0: i32) -> (i32, i32) {
    %c0_i32 = arith.constant 0 : i32
    %c0_i32_0 = arith.constant 0 : i32
    %c0_i32_1 = arith.constant 0 : i32
    return %c0_i32, %c0_i32_0 : i32, i32
  }
  func.func @transform_6(%arg0: i32) -> (i32, i32) {
    %c0_i32 = arith.constant 0 : i32
    %c0_i32_0 = arith.constant 0 : i32
    %c0_i32_1 = arith.constant 0 : i32
    return %c0_i32, %c0_i32_0 : i32, i32
  }
  func.func @transform_7(%arg0: i32) -> (i32, i32) {
    %c0_i32 = arith.constant 0 : i32
    %c0_i32_0 = arith.constant 0 : i32
    return %arg0, %c0_i32 : i32, i32
  }
}

module attributes {stable_mosaic.version = 11 : i64} {
  func.func @kernel(%arg0: i32, %arg1: memref<64x128xf32, #tpu.memory_space<vmem>>, %arg2: memref<128x128xf32, #tpu.memory_space<vmem>>, %arg3: memref<1x128xf32, #tpu.memory_space<vmem>>, %arg4: memref<128x128xf32, #tpu.memory_space<vmem>>, %arg5: memref<1x128xf32, #tpu.memory_space<vmem>>, %arg6: memref<128x128xf32, #tpu.memory_space<vmem>>, %arg7: memref<1x128xf32, #tpu.memory_space<vmem>>, %arg8: memref<64x128xf32, #tpu.memory_space<vmem>>) attributes {dimension_semantics = [#tpu.dimension_semantics<parallel>], iteration_bounds = array<i64: 1>, scalar_prefetch = 0 : i64, scratch_operands = 0 : i64, tpu.core_type = #tpu.core_type<tc>, window_params = [{transform_indices = @transform_0, window_bounds = array<i64: 64, 128>}, {pipeline_mode = #tpu.pipeline_mode<synchronous>, transform_indices = @transform_1, window_bounds = array<i64: 128, 128>}, {pipeline_mode = #tpu.pipeline_mode<synchronous>, transform_indices = @transform_2, window_bounds = array<i64: 1, 128>}, {pipeline_mode = #tpu.pipeline_mode<synchronous>, transform_indices = @transform_3, window_bounds = array<i64: 128, 128>}, {pipeline_mode = #tpu.pipeline_mode<synchronous>, transform_indices = @transform_4, window_bounds = array<i64: 1, 128>}, {pipeline_mode = #tpu.pipeline_mode<synchronous>, transform_indices = @transform_5, window_bounds = array<i64: 128, 128>}, {pipeline_mode = #tpu.pipeline_mode<synchronous>, transform_indices = @transform_6, window_bounds = array<i64: 1, 128>}, {transform_indices = @transform_7, window_bounds = array<i64: 64, 128>}]} {
    %c0 = arith.constant 0 : index
    %c0_0 = arith.constant 0 : index
    %0 = vector.load %arg1[%c0, %c0_0] : memref<64x128xf32, #tpu.memory_space<vmem>>, vector<64x128xf32>
    %c0_1 = arith.constant 0 : index
    %c0_2 = arith.constant 0 : index
    %1 = vector.load %arg2[%c0_1, %c0_2] : memref<128x128xf32, #tpu.memory_space<vmem>>, vector<128x128xf32>
    %c0_3 = arith.constant 0 : index
    %c0_4 = arith.constant 0 : index
    %2 = vector.load %arg3[%c0_3, %c0_4] : memref<1x128xf32, #tpu.memory_space<vmem>>, vector<1x128xf32>
    %cst = arith.constant dense<0.000000e+00> : vector<64x128xf32>
    %3 = tpu.matmul %0, %1, %cst {dimension_numbers = #tpu.dot_dimension_numbers<[1], [0], [0], [1], [0, 0, 1, 1], [], []>} : vector<64x128xf32>, vector<128x128xf32>, vector<64x128xf32> -> vector<64x128xf32>
    %4 = vector.broadcast %2 : vector<1x128xf32> to vector<64x128xf32>
    %5 = arith.addf %3, %4 : vector<64x128xf32>
    %cst_5 = arith.constant 0.000000e+00 : f32
    %6 = vector.broadcast %cst_5 : f32 to vector<64x128xf32>
    %7 = arith.maximumf %5, %6 : vector<64x128xf32>
    %c0_6 = arith.constant 0 : index
    %c0_7 = arith.constant 0 : index
    %8 = vector.load %arg4[%c0_6, %c0_7] : memref<128x128xf32, #tpu.memory_space<vmem>>, vector<128x128xf32>
    %c0_8 = arith.constant 0 : index
    %c0_9 = arith.constant 0 : index
    %9 = vector.load %arg5[%c0_8, %c0_9] : memref<1x128xf32, #tpu.memory_space<vmem>>, vector<1x128xf32>
    %cst_10 = arith.constant dense<0.000000e+00> : vector<64x128xf32>
    %10 = tpu.matmul %7, %8, %cst_10 {dimension_numbers = #tpu.dot_dimension_numbers<[1], [0], [0], [1], [0, 0, 1, 1], [], []>} : vector<64x128xf32>, vector<128x128xf32>, vector<64x128xf32> -> vector<64x128xf32>
    %11 = vector.broadcast %9 : vector<1x128xf32> to vector<64x128xf32>
    %12 = arith.addf %10, %11 : vector<64x128xf32>
    %cst_11 = arith.constant 0.000000e+00 : f32
    %13 = vector.broadcast %cst_11 : f32 to vector<64x128xf32>
    %14 = arith.maximumf %12, %13 : vector<64x128xf32>
    %c0_12 = arith.constant 0 : index
    %c0_13 = arith.constant 0 : index
    %15 = vector.load %arg6[%c0_12, %c0_13] : memref<128x128xf32, #tpu.memory_space<vmem>>, vector<128x128xf32>
    %c0_14 = arith.constant 0 : index
    %c0_15 = arith.constant 0 : index
    %16 = vector.load %arg7[%c0_14, %c0_15] : memref<1x128xf32, #tpu.memory_space<vmem>>, vector<1x128xf32>
    %cst_16 = arith.constant dense<0.000000e+00> : vector<64x128xf32>
    %17 = tpu.matmul %14, %15, %cst_16 {dimension_numbers = #tpu.dot_dimension_numbers<[1], [0], [0], [1], [0, 0, 1, 1], [], []>} : vector<64x128xf32>, vector<128x128xf32>, vector<64x128xf32> -> vector<64x128xf32>
    %18 = vector.broadcast %16 : vector<1x128xf32> to vector<64x128xf32>
    %19 = arith.addf %17, %18 : vector<64x128xf32>
    %c0_17 = arith.constant 0 : index
    %c0_18 = arith.constant 0 : index
    %20 = vector.load %arg8[%c0_17, %c0_18] : memref<64x128xf32, #tpu.memory_space<vmem>>, vector<64x128xf32>
    tpu.vector_store %arg8[%c0_17, %c0_18], %19 {strides = array<i32>} : memref<64x128xf32, #tpu.memory_space<vmem>>, vector<64x128xf32>,
    return
  }
  func.func @transform_0(%arg0: i32) -> (i32, i32) {
    %c0_i32 = arith.constant 0 : i32
    %c0_i32_0 = arith.constant 0 : i32
    return %arg0, %c0_i32 : i32, i32
  }
  func.func @transform_1(%arg0: i32) -> (i32, i32) {
    %c0_i32 = arith.constant 0 : i32
    %c0_i32_0 = arith.constant 0 : i32
    %c0_i32_1 = arith.constant 0 : i32
    return %c0_i32, %c0_i32_0 : i32, i32
  }
  func.func @transform_2(%arg0: i32) -> (i32, i32) {
    %c0_i32 = arith.constant 0 : i32
    %c0_i32_0 = arith.constant 0 : i32
    %c0_i32_1 = arith.constant 0 : i32
    return %c0_i32, %c0_i32_0 : i32, i32
  }
  func.func @transform_3(%arg0: i32) -> (i32, i32) {
    %c0_i32 = arith.constant 0 : i32
    %c0_i32_0 = arith.constant 0 : i32
    %c0_i32_1 = arith.constant 0 : i32
    return %c0_i32, %c0_i32_0 : i32, i32
  }
  func.func @transform_4(%arg0: i32) -> (i32, i32) {
    %c0_i32 = arith.constant 0 : i32
    %c0_i32_0 = arith.constant 0 : i32
    %c0_i32_1 = arith.constant 0 : i32
    return %c0_i32, %c0_i32_0 : i32, i32
  }
  func.func @transform_5(%arg0: i32) -> (i32, i32) {
    %c0_i32 = arith.constant 0 : i32
    %c0_i32_0 = arith.constant 0 : i32
    %c0_i32_1 = arith.constant 0 : i32
    return %c0_i32, %c0_i32_0 : i32, i32
  }
  func.func @transform_6(%arg0: i32) -> (i32, i32) {
    %c0_i32 = arith.constant 0 : i32
    %c0_i32_0 = arith.constant 0 : i32
    %c0_i32_1 = arith.constant 0 : i32
    return %c0_i32, %c0_i32_0 : i32, i32
  }
  func.func @transform_7(%arg0: i32) -> (i32, i32) {
    %c0_i32 = arith.constant 0 : i32
    %c0_i32_0 = arith.constant 0 : i32
    return %arg0, %c0_i32 : i32, i32
  }
}

</mosaic_0001>

<bundles_post_ra>
// kernel: _mlp_forward_impl.1
= control target key start
LH: loop header
LB: loop body
LE: loop exit
PB: predicated region body
PF: predicated region fallthrough
CT: control target
= control target key end

     0   :  { %s521_s1 = inlined_call_operand.vmem [shape: f32[128,128], index: 1, kind: input, shape index: {}]   ;;  %s522_s2 = inlined_call_operand.vmem [shape: f32[1,128], index: 2, kind: input, shape index: {}]   ;;  %s523_s0 = inlined_call_operand.vmem [shape: f32[64,128], index: 0, kind: input, shape index: {}]   ;;  %s524_s3 = inlined_call_operand.vmem [shape: f32[128,128], index: 3, kind: input, shape index: {}]   ;;  %s525_s4 = inlined_call_operand.vmem [shape: f32[1,128], index: 4, kind: input, shape index: {}]   ;;  %s526_s5 = inlined_call_operand.vmem [shape: f32[128,128], index: 5, kind: input, shape index: {}]   ;;  %s527_s6 = inlined_call_operand.vmem [shape: f32[1,128], index: 6, kind: input, shape index: {}]   ;;  %s528_s7 = inlined_call_operand.vmem [shape: f32[64,128], index: 7, kind: output, shape index: {}]  }
   0x1   :  { %v49_v0 = vld [vmem:[%s521_s1 + $0x78] sm:$0xff]  ;;  %v48_v1 = vld [vmem:[%s521_s1 + $0x70] sm:$0xff]  ;;  %v47_v2 = vld [vmem:[%s521_s1 + $0x68] sm:$0xff] }
   0x2   :  { %54 = vmatpush.msra.mxu0 %v49_v0  ;;  %245 = vmatpush.msra.mxu3 %v49_v0  ;;  %v46_v3 = vld [vmem:[%s521_s1 + $0x60] sm:$0xff]  ;;  %v45_v4 = vld [vmem:[%s521_s1 + $0x58] sm:$0xff]  ;;  %v44_v5 = vld [vmem:[%s521_s1 + $0x50] sm:$0xff] }
   0x3   :  { %v43_v6 = vld [vmem:[%s521_s1 + $0x48] sm:$0xff]  ;;  %v42_v7 = vld [vmem:[%s521_s1 + $0x40] sm:$0xff]  ;;  %v41_v8 = vld [vmem:[%s521_s1 + $0x38] sm:$0xff] }
   0x4   :  { %55 = vmatpush.msra.mxu0 %v48_v1  ;;  %246 = vmatpush.msra.mxu3 %v48_v1  ;;  %v40_v9 = vld [vmem:[%s521_s1 + $0x30] sm:$0xff]  ;;  %v39_v10 = vld [vmem:[%s521_s1 + $0x28] sm:$0xff]  ;;  %v38_v11 = vld [vmem:[%s521_s1 + $0x20] sm:$0xff] }
   0x5   :  { %v37_v12 = vld [vmem:[%s521_s1 + $0x18] sm:$0xff]  ;;  %v36_v13 = vld [vmem:[%s521_s1 + $0x10] sm:$0xff]  ;;  %v35_v14 = vld [vmem:[%s521_s1 + $0x8] sm:$0xff] }
   0x6   :  { %56 = vmatpush.msra.mxu0 %v47_v2  ;;  %247 = vmatpush.msra.mxu3 %v47_v2  ;;  %v34_v15 = vld [vmem:[%s521_s1] sm:$0xff]  ;;  %v32_v17 = vld [vmem:[%s523_s0 + $0x30] sm:$0xff]  ;;  %v27_v18 = vld [vmem:[%s523_s0 + $0x8] sm:$0xff] }
   0x7   :  { %v26_v16 = vld [vmem:[%s523_s0] sm:$0xff]  ;;  %v33_v19 = vld [vmem:[%s523_s0 + $0x38] sm:$0xff]  ;;  %v117_v21 = vld [vmem:[%s524_s3 + $0x70] sm:$0xff] }
   0x8   :  { %57 = vmatpush.msra.mxu0 %v46_v3  ;;  %248 = vmatpush.msra.mxu3 %v46_v3  ;;  %v118_v20 = vld [vmem:[%s524_s3 + $0x78] sm:$0xff]  ;;  %v116_v22 = vld [vmem:[%s524_s3 + $0x68] sm:$0xff]  ;;  %v115_v23 = vld [vmem:[%s524_s3 + $0x60] sm:$0xff] }
   0x9   :  { %123 = vmatpush.msra.mxu1 %v118_v20  ;;  %v28_v24 = vld [vmem:[%s523_s0 + $0x10] sm:$0xff]  ;;  %v114_v25 = vld [vmem:[%s524_s3 + $0x58] sm:$0xff]  ;;  %v112_v27 = vld [vmem:[%s524_s3 + $0x48] sm:$0xff] }
   0xa   :  { %58 = vmatpush.msra.mxu0 %v45_v4  ;;  %249 = vmatpush.msra.mxu3 %v45_v4  ;;  %v113_v26 = vld [vmem:[%s524_s3 + $0x50] sm:$0xff]  ;;  %v111_v28 = vld [vmem:[%s524_s3 + $0x40] sm:$0xff]  ;;  %v29_v29 = vld [vmem:[%s523_s0 + $0x18] sm:$0xff] }
   0xb   :  { %124 = vmatpush.msra.mxu1 %v117_v21  ;;  %v110_v30 = vld [vmem:[%s524_s3 + $0x38] sm:$0xff]  ;;  %v109_v31 = vld [vmem:[%s524_s3 + $0x30] sm:$0xff]  ;;  %v108_v32 = vld [vmem:[%s524_s3 + $0x28] sm:$0xff] }
   0xc   :  { %59 = vmatpush.msra.mxu0 %v44_v5  ;;  %250 = vmatpush.msra.mxu3 %v44_v5  ;;  %v107_v33 = vld [vmem:[%s524_s3 + $0x20] sm:$0xff]  ;;  %v106_v35 = vld [vmem:[%s524_s3 + $0x18] sm:$0xff]  ;;  %v31_v36 = vld [vmem:[%s523_s0 + $0x28] sm:$0xff] }
   0xd   :  { %125 = vmatpush.msra.mxu1 %v116_v22  ;;  %v30_v34 = vld [vmem:[%s523_s0 + $0x20] sm:$0xff]  ;;  %v105_v37 = vld [vmem:[%s524_s3 + $0x10] sm:$0xff]  ;;  %v104_v38 = vld [vmem:[%s524_s3 + $0x8] sm:$0xff] }
   0xe   :  { %60 = vmatpush.msra.mxu0 %v43_v6  ;;  %251 = vmatpush.msra.mxu3 %v43_v6  ;;  %v103_v39 = vld [vmem:[%s524_s3] sm:$0xff]  ;;  %v187_v54 = vld [vmem:[%s526_s5 + $0x78] sm:$0xff]  ;;  %v186_v55 = vld [vmem:[%s526_s5 + $0x70] sm:$0xff] }
   0xf   :  { %126 = vmatpush.msra.mxu1 %v115_v23  ;;  %v277_v40 = vld [vmem:[%s522_s2] ss:$0 sm:$0xff]  ;;  %192 = vmatpush.msra.mxu2 %v187_v54  ;;  %v185_v56 = vld [vmem:[%s526_s5 + $0x68] sm:$0xff]  ;;  %v183_v61 = vld [vmem:[%s526_s5 + $0x58] sm:$0xff] }
  0x10   :  { %61 = vmatpush.msra.mxu0 %v42_v7  ;;  %252 = vmatpush.msra.mxu3 %v42_v7  ;;  %v184_v59 = vld [vmem:[%s526_s5 + $0x60] sm:$0xff]  ;;  %v182_v62 = vld [vmem:[%s526_s5 + $0x50] sm:$0xff]  ;;  %v181_v63 = vld [vmem:[%s526_s5 + $0x48] sm:$0xff] }
  0x11   :  { %127 = vmatpush.msra.mxu1 %v114_v25  ;;  %193 = vmatpush.msra.mxu2 %v186_v55  ;;  %v180_v2 = vld [vmem:[%s526_s5 + $0x40] sm:$0xff]  ;;  %v179_v4 = vld [vmem:[%s526_s5 + $0x38] sm:$0xff]  ;;  %v178_v5 = vld [vmem:[%s526_s5 + $0x30] sm:$0xff] }
  0x12   :  { %62 = vmatpush.msra.mxu0 %v41_v8  ;;  %253 = vmatpush.msra.mxu3 %v41_v8  ;;  %v177_v6 = vld [vmem:[%s526_s5 + $0x28] sm:$0xff] }
  0x13   :  { %128 = vmatpush.msra.mxu1 %v113_v26  ;;  %194 = vmatpush.msra.mxu2 %v185_v56 }
  0x14   :  { %63 = vmatpush.msra.mxu0 %v40_v9  ;;  %254 = vmatpush.msra.mxu3 %v40_v9  ;;  %v176_v9 = vld [vmem:[%s526_s5 + $0x20] sm:$0xff] }
  0x15   :  { %129 = vmatpush.msra.mxu1 %v112_v27  ;;  %195 = vmatpush.msra.mxu2 %v184_v59 }
  0x16   :  { %64 = vmatpush.msra.mxu0 %v39_v10  ;;  %255 = vmatpush.msra.mxu3 %v39_v10 }
  0x17   :  { %130 = vmatpush.msra.mxu1 %v111_v28  ;;  %196 = vmatpush.msra.mxu2 %v183_v61 }
  0x18   :  { %65 = vmatpush.msra.mxu0 %v38_v11  ;;  %256 = vmatpush.msra.mxu3 %v38_v11  ;;  %v175_v11 = vld [vmem:[%s526_s5 + $0x18] sm:$0xff] }
  0x19   :  { %131 = vmatpush.msra.mxu1 %v110_v30  ;;  %197 = vmatpush.msra.mxu2 %v182_v62 }
  0x1a   :  { %66 = vmatpush.msra.mxu0 %v37_v12  ;;  %257 = vmatpush.msra.mxu3 %v37_v12 }
  0x1b   :  { %132 = vmatpush.msra.mxu1 %v109_v31  ;;  %198 = vmatpush.msra.mxu2 %v181_v63 }
  0x1c   :  { %67 = vmatpush.msra.mxu0 %v36_v13  ;;  %258 = vmatpush.msra.mxu3 %v36_v13 }
  0x1d   :  { %133 = vmatpush.msra.mxu1 %v108_v32  ;;  %199 = vmatpush.msra.mxu2 %v180_v2 }
  0x1e   :  { %68 = vmatpush.msra.mxu0 %v35_v14  ;;  %259 = vmatpush.msra.mxu3 %v35_v14  ;;  %v174_v14 = vld [vmem:[%s526_s5 + $0x10] sm:$0xff] }
  0x1f   :  { %134 = vmatpush.msra.mxu1 %v107_v33  ;;  %200 = vmatpush.msra.mxu2 %v179_v4 }
  0x20   :  { %69 = vmatpush.msra.mxu0 %v34_v15  ;;  %260 = vmatpush.msra.mxu3 %v34_v15  ;;  %v173_v15 = vld [vmem:[%s526_s5 + $0x8] sm:$0xff] }
  0x21   :  { %70 = vmatmul.f32.vlgmr.msra.gmra.mxu0 %v26_v16  ;;  %88 = vmatmul.f32.vlgmr.msra.gmra.mxu3 %v32_v17  ;;  %v172_v16 = vld [vmem:[%s526_s5] sm:$0xff] }
  0x22   :  { %261 = vmatpush.msrb.mxu3 %v118_v20  ;;  %135 = vmatpush.msra.mxu1 %v106_v35  ;;  %v278_v17 = vld [vmem:[%s525_s4] ss:$0 sm:$0xff] }
  0x23   :  { %201 = vmatpush.msra.mxu2 %v178_v5 }
  0x24   :  { %262 = vmatpush.msrb.mxu3 %v117_v21  ;;  %136 = vmatpush.msra.mxu1 %v105_v37 }
  0x25   :  { %202 = vmatpush.msra.mxu2 %v177_v6 }
  0x26   :  { %263 = vmatpush.msrb.mxu3 %v116_v22  ;;  %137 = vmatpush.msra.mxu1 %v104_v38 }
  0x27   :  { %203 = vmatpush.msra.mxu2 %v176_v9 }
  0x28   :  { %264 = vmatpush.msrb.mxu3 %v115_v23  ;;  %138 = vmatpush.msra.mxu1 %v103_v39 }
  0x29   :  { %73 = vmatmul.f32.gmra.mxu0 %v27_v18  ;;  %91 = vmatmul.f32.gmra.mxu3 %v33_v19 }
  0x2a   :  { %265 = vmatpush.msrb.mxu3 %v114_v25  ;;  %204 = vmatpush.msra.mxu2 %v175_v11 }
  0x2c   :  { %266 = vmatpush.msrb.mxu3 %v113_v26  ;;  %205 = vmatpush.msra.mxu2 %v174_v14 }
  0x2e   :  { %267 = vmatpush.msrb.mxu3 %v112_v27  ;;  %206 = vmatpush.msra.mxu2 %v173_v15 }
  0x30   :  { %268 = vmatpush.msrb.mxu3 %v111_v28  ;;  %207 = vmatpush.msra.mxu2 %v172_v16 }
  0x31   :  { %76 = vmatmul.f32.gmra.mxu0 %v28_v24 }
  0x32   :  { %269 = vmatpush.msrb.mxu3 %v110_v30 }
  0x34   :  { %270 = vmatpush.msrb.mxu3 %v109_v31 }
  0x36   :  { %271 = vmatpush.msrb.mxu3 %v108_v32 }
  0x38   :  { %272 = vmatpush.msrb.mxu3 %v107_v33 }
  0x39   :  { %79 = vmatmul.f32.gmra.mxu0 %v29_v29 }
  0x3a   :  { %273 = vmatpush.msrb.mxu3 %v106_v35 }
  0x3c   :  { %274 = vmatpush.msrb.mxu3 %v105_v37 }
  0x3e   :  { %275 = vmatpush.msrb.mxu3 %v104_v38 }
  0x40   :  { %276 = vmatpush.msrb.mxu3 %v103_v39 }
  0x41   :  { %82 = vmatmul.f32.gmra.mxu0 %v30_v34 }
  0x49   :  { %85 = vmatmul.f32.gmra.mxu0 %v31_v36 }
  0x9e   :  { %v71_v41 = vpop.f32.mrf.mxu0 }
  0x9f   :  { %v72_v42 = vadd.f32 %v277_v40, %v71_v41 }
  0xa1   :  { %v95_v43 = vmax.f32 %v72_v42, 0.0  ;;  %v279_v42 = vld [vmem:[%s527_s6] ss:$0 sm:$0xff] }
  0xa3   :  { %139 = vmatmul.f32.vlgmr.msra.gmra.mxu1 %v95_v43 }
  0xa4   :  { %v89_v46 = vpop.f32.mrf.mxu3 }
  0xa5   :  { %v90_v12 = vadd.f32 %v277_v40, %v89_v46 }
  0xa6   :  { %v74_v44 = vpop.f32.mrf.mxu0 }
  0xa7   :  { %v75_v45 = vadd.f32 %v277_v40, %v74_v44  ;;  %v101_v13 = vmax.f32 %v90_v12, 0.0 }
  0xa9   :  { %v96_v47 = vmax.f32 %v75_v45, 0.0 }
  0xab   :  { %142 = vmatmul.f32.gmra.mxu1 %v96_v47 }
  0xac   :  { %v92_v50 = vpop.f32.mrf.mxu3 }
  0xad   :  { %v93_v52 = vadd.f32 %v277_v40, %v92_v50 }
  0xae   :  { %v77_v48 = vpop.f32.mrf.mxu0 }
  0xaf   :  { %v78_v49 = vadd.f32 %v277_v40, %v77_v48  ;;  %v102_v53 = vmax.f32 %v93_v52, 0.0 }
  0xb1   :  { %v97_v51 = vmax.f32 %v78_v49, 0.0  ;;  %160 = vmatmul.f32.vlgmr.msrb.gmra.mxu3 %v102_v53 }
  0xb3   :  { %145 = vmatmul.f32.gmra.mxu1 %v97_v51 }
  0xb6   :  { %v80_v57 = vpop.f32.mrf.mxu0 }
  0xb7   :  { %v81_v58 = vadd.f32 %v277_v40, %v80_v57 }
  0xb9   :  { %v98_v60 = vmax.f32 %v81_v58, 0.0 }
  0xbb   :  { %148 = vmatmul.f32.gmra.mxu1 %v98_v60 }
  0xbe   :  { %v83_v0 = vpop.f32.mrf.mxu0 }
  0xbf   :  { %v84_v1 = vadd.f32 %v277_v40, %v83_v0 }
  0xc1   :  { %v99_v3 = vmax.f32 %v84_v1, 0.0 }
  0xc3   :  { %151 = vmatmul.f32.gmra.mxu1 %v99_v3 }
  0xc6   :  { %v86_v7 = vpop.f32.mrf.mxu0 }
  0xc7   :  { %v87_v8 = vadd.f32 %v277_v40, %v86_v7 }
  0xc9   :  { %v100_v10 = vmax.f32 %v87_v8, 0.0 }
  0xcb   :  { %154 = vmatmul.f32.gmra.mxu1 %v100_v10 }
  0xd3   :  { %157 = vmatmul.f32.gmra.mxu1 %v101_v13 }
 0x120   :  { %v140_v18 = vpop.f32.mrf.mxu1 }
 0x121   :  { %v141_v19 = vadd.f32 %v278_v17, %v140_v18 }
 0x123   :  { %v164_v20 = vmax.f32 %v141_v19, 0.0 }
 0x125   :  { %208 = vmatmul.f32.vlgmr.msra.gmra.mxu2 %v164_v20 }
 0x128   :  { %v143_v21 = vpop.f32.mrf.mxu1 }
 0x129   :  { %v144_v22 = vadd.f32 %v278_v17, %v143_v21 }
 0x12b   :  { %v165_v23 = vmax.f32 %v144_v22, 0.0 }
 0x12d   :  { %211 = vmatmul.f32.gmra.mxu2 %v165_v23 }
 0x130   :  { %v146_v24 = vpop.f32.mrf.mxu1 }
 0x131   :  { %v147_v25 = vadd.f32 %v278_v17, %v146_v24 }
 0x133   :  { %v166_v26 = vmax.f32 %v147_v25, 0.0 }
 0x134   :  { %v161_v38 = vpop.f32.mrf.mxu3 }
 0x135   :  { %214 = vmatmul.f32.gmra.mxu2 %v166_v26  ;;  %v162_v40 = vadd.f32 %v278_v17, %v161_v38 }
 0x137   :  { %v171_v41 = vmax.f32 %v162_v40, 0.0 }
 0x138   :  { %v149_v27 = vpop.f32.mrf.mxu1 }
 0x139   :  { %v150_v28 = vadd.f32 %v278_v17, %v149_v27 }
 0x13b   :  { %v167_v29 = vmax.f32 %v150_v28, 0.0 }
 0x13d   :  { %217 = vmatmul.f32.gmra.mxu2 %v167_v29 }
 0x140   :  { %v152_v30 = vpop.f32.mrf.mxu1 }
 0x141   :  { %v153_v31 = vadd.f32 %v278_v17, %v152_v30 }
 0x143   :  { %v168_v32 = vmax.f32 %v153_v31, 0.0 }
 0x145   :  { %220 = vmatmul.f32.gmra.mxu2 %v168_v32 }
 0x148   :  { %v155_v33 = vpop.f32.mrf.mxu1 }
 0x149   :  { %v156_v34 = vadd.f32 %v278_v17, %v155_v33 }
 0x14b   :  { %v169_v35 = vmax.f32 %v156_v34, 0.0 }
 0x14d   :  { %223 = vmatmul.f32.gmra.mxu2 %v169_v35 }
 0x150   :  { %v158_v36 = vpop.f32.mrf.mxu1 }
 0x151   :  { %v159_v37 = vadd.f32 %v278_v17, %v158_v36 }
 0x153   :  { %v170_v39 = vmax.f32 %v159_v37, 0.0 }
 0x155   :  { %226 = vmatmul.f32.gmra.mxu2 %v170_v39 }
 0x15d   :  { %229 = vmatmul.f32.gmra.mxu2 %v171_v41 }
 0x1a8   :  { %v209_v43 = vpop.f32.mrf.mxu2 }
 0x1a9   :  { %v210_v44 = vadd.f32 %v279_v42, %v209_v43 }
 0x1ab   :  { %233 = vst [vmem:[%s528_s7] sm:$0xff] %v210_v44 }
 0x1b0   :  { %v212_v45 = vpop.f32.mrf.mxu2 }
 0x1b1   :  { %v213_v46 = vadd.f32 %v279_v42, %v212_v45 }
 0x1b3   :  { %234 = vst [vmem:[%s528_s7 + $0x8] sm:$0xff] %v213_v46 }
 0x1b8   :  { %v215_v47 = vpop.f32.mrf.mxu2 }
 0x1b9   :  { %v216_v48 = vadd.f32 %v279_v42, %v215_v47 }
 0x1bb   :  { %235 = vst [vmem:[%s528_s7 + $0x10] sm:$0xff] %v216_v48 }
 0x1c0   :  { %v218_v49 = vpop.f32.mrf.mxu2 }
 0x1c1   :  { %v219_v50 = vadd.f32 %v279_v42, %v218_v49 }
 0x1c3   :  { %236 = vst [vmem:[%s528_s7 + $0x18] sm:$0xff] %v219_v50 }
 0x1c8   :  { %v221_v51 = vpop.f32.mrf.mxu2 }
 0x1c9   :  { %v222_v52 = vadd.f32 %v279_v42, %v221_v51 }
 0x1cb   :  { %237 = vst [vmem:[%s528_s7 + $0x20] sm:$0xff] %v222_v52 }
 0x1d0   :  { %v224_v53 = vpop.f32.mrf.mxu2 }
 0x1d1   :  { %v225_v54 = vadd.f32 %v279_v42, %v224_v53 }
 0x1d3   :  { %238 = vst [vmem:[%s528_s7 + $0x28] sm:$0xff] %v225_v54 }
 0x1d8   :  { %v227_v55 = vpop.f32.mrf.mxu2 }
 0x1d9   :  { %v228_v56 = vadd.f32 %v279_v42, %v227_v55 }
 0x1db   :  { %239 = vst [vmem:[%s528_s7 + $0x30] sm:$0xff] %v228_v56 }
 0x1e0   :  { %v230_v57 = vpop.f32.mrf.mxu2 }
 0x1e1   :  { %v231_v58 = vadd.f32 %v279_v42, %v230_v57 }
 0x1e3   :  { %240 = vst [vmem:[%s528_s7 + $0x38] sm:$0xff] %v231_v58 }

// kernel: _mlp_forward_impl.1
= control target key start
LH: loop header
LB: loop body
LE: loop exit
PB: predicated region body
PF: predicated region fallthrough
CT: control target
= control target key end

     0   :  { %s521_s1 = inlined_call_operand.vmem [shape: f32[128,128], index: 1, kind: input, shape index: {}]   ;;  %s522_s2 = inlined_call_operand.vmem [shape: f32[1,128], index: 2, kind: input, shape index: {}]   ;;  %s523_s0 = inlined_call_operand.vmem [shape: f32[64,128], index: 0, kind: input, shape index: {}]   ;;  %s524_s3 = inlined_call_operand.vmem [shape: f32[128,128], index: 3, kind: input, shape index: {}]   ;;  %s525_s4 = inlined_call_operand.vmem [shape: f32[1,128], index: 4, kind: input, shape index: {}]   ;;  %s526_s5 = inlined_call_operand.vmem [shape: f32[128,128], index: 5, kind: input, shape index: {}]   ;;  %s527_s6 = inlined_call_operand.vmem [shape: f32[1,128], index: 6, kind: input, shape index: {}]   ;;  %s528_s7 = inlined_call_operand.vmem [shape: f32[64,128], index: 7, kind: output, shape index: {}]  }
   0x1   :  { %v49_v0 = vld [vmem:[%s521_s1 + $0x78] sm:$0xff]  ;;  %v48_v1 = vld [vmem:[%s521_s1 + $0x70] sm:$0xff]  ;;  %v47_v2 = vld [vmem:[%s521_s1 + $0x68] sm:$0xff] }
   0x2   :  { %54 = vmatpush.msra.mxu0 %v49_v0  ;;  %245 = vmatpush.msra.mxu3 %v49_v0  ;;  %v46_v3 = vld [vmem:[%s521_s1 + $0x60] sm:$0xff]  ;;  %v45_v4 = vld [vmem:[%s521_s1 + $0x58] sm:$0xff]  ;;  %v44_v5 = vld [vmem:[%s521_s1 + $0x50] sm:$0xff] }
   0x3   :  { %v43_v6 = vld [vmem:[%s521_s1 + $0x48] sm:$0xff]  ;;  %v42_v7 = vld [vmem:[%s521_s1 + $0x40] sm:$0xff]  ;;  %v41_v8 = vld [vmem:[%s521_s1 + $0x38] sm:$0xff] }
   0x4   :  { %55 = vmatpush.msra.mxu0 %v48_v1  ;;  %246 = vmatpush.msra.mxu3 %v48_v1  ;;  %v40_v9 = vld [vmem:[%s521_s1 + $0x30] sm:$0xff]  ;;  %v39_v10 = vld [vmem:[%s521_s1 + $0x28] sm:$0xff]  ;;  %v38_v11 = vld [vmem:[%s521_s1 + $0x20] sm:$0xff] }
   0x5   :  { %v37_v12 = vld [vmem:[%s521_s1 + $0x18] sm:$0xff]  ;;  %v36_v13 = vld [vmem:[%s521_s1 + $0x10] sm:$0xff]  ;;  %v35_v14 = vld [vmem:[%s521_s1 + $0x8] sm:$0xff] }
   0x6   :  { %56 = vmatpush.msra.mxu0 %v47_v2  ;;  %247 = vmatpush.msra.mxu3 %v47_v2  ;;  %v34_v15 = vld [vmem:[%s521_s1] sm:$0xff]  ;;  %v32_v17 = vld [vmem:[%s523_s0 + $0x30] sm:$0xff]  ;;  %v27_v18 = vld [vmem:[%s523_s0 + $0x8] sm:$0xff] }
   0x7   :  { %v26_v16 = vld [vmem:[%s523_s0] sm:$0xff]  ;;  %v33_v19 = vld [vmem:[%s523_s0 + $0x38] sm:$0xff]  ;;  %v117_v21 = vld [vmem:[%s524_s3 + $0x70] sm:$0xff] }
   0x8   :  { %57 = vmatpush.msra.mxu0 %v46_v3  ;;  %248 = vmatpush.msra.mxu3 %v46_v3  ;;  %v118_v20 = vld [vmem:[%s524_s3 + $0x78] sm:$0xff]  ;;  %v116_v22 = vld [vmem:[%s524_s3 + $0x68] sm:$0xff]  ;;  %v115_v23 = vld [vmem:[%s524_s3 + $0x60] sm:$0xff] }
   0x9   :  { %123 = vmatpush.msra.mxu1 %v118_v20  ;;  %v28_v24 = vld [vmem:[%s523_s0 + $0x10] sm:$0xff]  ;;  %v114_v25 = vld [vmem:[%s524_s3 + $0x58] sm:$0xff]  ;;  %v112_v27 = vld [vmem:[%s524_s3 + $0x48] sm:$0xff] }
   0xa   :  { %58 = vmatpush.msra.mxu0 %v45_v4  ;;  %249 = vmatpush.msra.mxu3 %v45_v4  ;;  %v113_v26 = vld [vmem:[%s524_s3 + $0x50] sm:$0xff]  ;;  %v111_v28 = vld [vmem:[%s524_s3 + $0x40] sm:$0xff]  ;;  %v29_v29 = vld [vmem:[%s523_s0 + $0x18] sm:$0xff] }
   0xb   :  { %124 = vmatpush.msra.mxu1 %v117_v21  ;;  %v110_v30 = vld [vmem:[%s524_s3 + $0x38] sm:$0xff]  ;;  %v109_v31 = vld [vmem:[%s524_s3 + $0x30] sm:$0xff]  ;;  %v108_v32 = vld [vmem:[%s524_s3 + $0x28] sm:$0xff] }
   0xc   :  { %59 = vmatpush.msra.mxu0 %v44_v5  ;;  %250 = vmatpush.msra.mxu3 %v44_v5  ;;  %v107_v33 = vld [vmem:[%s524_s3 + $0x20] sm:$0xff]  ;;  %v106_v35 = vld [vmem:[%s524_s3 + $0x18] sm:$0xff]  ;;  %v31_v36 = vld [vmem:[%s523_s0 + $0x28] sm:$0xff] }
   0xd   :  { %125 = vmatpush.msra.mxu1 %v116_v22  ;;  %v30_v34 = vld [vmem:[%s523_s0 + $0x20] sm:$0xff]  ;;  %v105_v37 = vld [vmem:[%s524_s3 + $0x10] sm:$0xff]  ;;  %v104_v38 = vld [vmem:[%s524_s3 + $0x8] sm:$0xff] }
   0xe   :  { %60 = vmatpush.msra.mxu0 %v43_v6  ;;  %251 = vmatpush.msra.mxu3 %v43_v6  ;;  %v103_v39 = vld [vmem:[%s524_s3] sm:$0xff]  ;;  %v187_v54 = vld [vmem:[%s526_s5 + $0x78] sm:$0xff]  ;;  %v186_v55 = vld [vmem:[%s526_s5 + $0x70] sm:$0xff] }
   0xf   :  { %126 = vmatpush.msra.mxu1 %v115_v23  ;;  %v277_v40 = vld [vmem:[%s522_s2] ss:$0 sm:$0xff]  ;;  %192 = vmatpush.msra.mxu2 %v187_v54  ;;  %v185_v56 = vld [vmem:[%s526_s5 + $0x68] sm:$0xff]  ;;  %v183_v61 = vld [vmem:[%s526_s5 + $0x58] sm:$0xff] }
  0x10   :  { %61 = vmatpush.msra.mxu0 %v42_v7  ;;  %252 = vmatpush.msra.mxu3 %v42_v7  ;;  %v184_v59 = vld [vmem:[%s526_s5 + $0x60] sm:$0xff]  ;;  %v182_v62 = vld [vmem:[%s526_s5 + $0x50] sm:$0xff]  ;;  %v181_v63 = vld [vmem:[%s526_s5 + $0x48] sm:$0xff] }
  0x11   :  { %127 = vmatpush.msra.mxu1 %v114_v25  ;;  %193 = vmatpush.msra.mxu2 %v186_v55  ;;  %v180_v2 = vld [vmem:[%s526_s5 + $0x40] sm:$0xff]  ;;  %v179_v4 = vld [vmem:[%s526_s5 + $0x38] sm:$0xff]  ;;  %v178_v5 = vld [vmem:[%s526_s5 + $0x30] sm:$0xff] }
  0x12   :  { %62 = vmatpush.msra.mxu0 %v41_v8  ;;  %253 = vmatpush.msra.mxu3 %v41_v8  ;;  %v177_v6 = vld [vmem:[%s526_s5 + $0x28] sm:$0xff] }
  0x13   :  { %128 = vmatpush.msra.mxu1 %v113_v26  ;;  %194 = vmatpush.msra.mxu2 %v185_v56 }
  0x14   :  { %63 = vmatpush.msra.mxu0 %v40_v9  ;;  %254 = vmatpush.msra.mxu3 %v40_v9  ;;  %v176_v9 = vld [vmem:[%s526_s5 + $0x20] sm:$0xff] }
  0x15   :  { %129 = vmatpush.msra.mxu1 %v112_v27  ;;  %195 = vmatpush.msra.mxu2 %v184_v59 }
  0x16   :  { %64 = vmatpush.msra.mxu0 %v39_v10  ;;  %255 = vmatpush.msra.mxu3 %v39_v10 }
  0x17   :  { %130 = vmatpush.msra.mxu1 %v111_v28  ;;  %196 = vmatpush.msra.mxu2 %v183_v61 }
  0x18   :  { %65 = vmatpush.msra.mxu0 %v38_v11  ;;  %256 = vmatpush.msra.mxu3 %v38_v11  ;;  %v175_v11 = vld [vmem:[%s526_s5 + $0x18] sm:$0xff] }
  0x19   :  { %131 = vmatpush.msra.mxu1 %v110_v30  ;;  %197 = vmatpush.msra.mxu2 %v182_v62 }
  0x1a   :  { %66 = vmatpush.msra.mxu0 %v37_v12  ;;  %257 = vmatpush.msra.mxu3 %v37_v12 }
  0x1b   :  { %132 = vmatpush.msra.mxu1 %v109_v31  ;;  %198 = vmatpush.msra.mxu2 %v181_v63 }
  0x1c   :  { %67 = vmatpush.msra.mxu0 %v36_v13  ;;  %258 = vmatpush.msra.mxu3 %v36_v13 }
  0x1d   :  { %133 = vmatpush.msra.mxu1 %v108_v32  ;;  %199 = vmatpush.msra.mxu2 %v180_v2 }
  0x1e   :  { %68 = vmatpush.msra.mxu0 %v35_v14  ;;  %259 = vmatpush.msra.mxu3 %v35_v14  ;;  %v174_v14 = vld [vmem:[%s526_s5 + $0x10] sm:$0xff] }
  0x1f   :  { %134 = vmatpush.msra.mxu1 %v107_v33  ;;  %200 = vmatpush.msra.mxu2 %v179_v4 }
  0x20   :  { %69 = vmatpush.msra.mxu0 %v34_v15  ;;  %260 = vmatpush.msra.mxu3 %v34_v15  ;;  %v173_v15 = vld [vmem:[%s526_s5 + $0x8] sm:$0xff] }
  0x21   :  { %70 = vmatmul.f32.vlgmr.msra.gmra.mxu0 %v26_v16  ;;  %88 = vmatmul.f32.vlgmr.msra.gmra.mxu3 %v32_v17  ;;  %v172_v16 = vld [vmem:[%s526_s5] sm:$0xff] }
  0x22   :  { %261 = vmatpush.msrb.mxu3 %v118_v20  ;;  %135 = vmatpush.msra.mxu1 %v106_v35  ;;  %v278_v17 = vld [vmem:[%s525_s4] ss:$0 sm:$0xff] }
  0x23   :  { %201 = vmatpush.msra.mxu2 %v178_v5 }
  0x24   :  { %262 = vmatpush.msrb.mxu3 %v117_v21  ;;  %136 = vmatpush.msra.mxu1 %v105_v37 }
  0x25   :  { %202 = vmatpush.msra.mxu2 %v177_v6 }
  0x26   :  { %263 = vmatpush.msrb.mxu3 %v116_v22  ;;  %137 = vmatpush.msra.mxu1 %v104_v38 }
  0x27   :  { %203 = vmatpush.msra.mxu2 %v176_v9 }
  0x28   :  { %264 = vmatpush.msrb.mxu3 %v115_v23  ;;  %138 = vmatpush.msra.mxu1 %v103_v39 }
  0x29   :  { %73 = vmatmul.f32.gmra.mxu0 %v27_v18  ;;  %91 = vmatmul.f32.gmra.mxu3 %v33_v19 }
  0x2a   :  { %265 = vmatpush.msrb.mxu3 %v114_v25  ;;  %204 = vmatpush.msra.mxu2 %v175_v11 }
  0x2c   :  { %266 = vmatpush.msrb.mxu3 %v113_v26  ;;  %205 = vmatpush.msra.mxu2 %v174_v14 }
  0x2e   :  { %267 = vmatpush.msrb.mxu3 %v112_v27  ;;  %206 = vmatpush.msra.mxu2 %v173_v15 }
  0x30   :  { %268 = vmatpush.msrb.mxu3 %v111_v28  ;;  %207 = vmatpush.msra.mxu2 %v172_v16 }
  0x31   :  { %76 = vmatmul.f32.gmra.mxu0 %v28_v24 }
  0x32   :  { %269 = vmatpush.msrb.mxu3 %v110_v30 }
  0x34   :  { %270 = vmatpush.msrb.mxu3 %v109_v31 }
  0x36   :  { %271 = vmatpush.msrb.mxu3 %v108_v32 }
  0x38   :  { %272 = vmatpush.msrb.mxu3 %v107_v33 }
  0x39   :  { %79 = vmatmul.f32.gmra.mxu0 %v29_v29 }
  0x3a   :  { %273 = vmatpush.msrb.mxu3 %v106_v35 }
  0x3c   :  { %274 = vmatpush.msrb.mxu3 %v105_v37 }
  0x3e   :  { %275 = vmatpush.msrb.mxu3 %v104_v38 }
  0x40   :  { %276 = vmatpush.msrb.mxu3 %v103_v39 }
  0x41   :  { %82 = vmatmul.f32.gmra.mxu0 %v30_v34 }
  0x49   :  { %85 = vmatmul.f32.gmra.mxu0 %v31_v36 }
  0x9e   :  { %v71_v41 = vpop.f32.mrf.mxu0 }
  0x9f   :  { %v72_v42 = vadd.f32 %v277_v40, %v71_v41 }
  0xa1   :  { %v95_v43 = vmax.f32 %v72_v42, 0.0  ;;  %v279_v42 = vld [vmem:[%s527_s6] ss:$0 sm:$0xff] }
  0xa3   :  { %139 = vmatmul.f32.vlgmr.msra.gmra.mxu1 %v95_v43 }
  0xa4   :  { %v89_v46 = vpop.f32.mrf.mxu3 }
  0xa5   :  { %v90_v12 = vadd.f32 %v277_v40, %v89_v46 }
  0xa6   :  { %v74_v44 = vpop.f32.mrf.mxu0 }
  0xa7   :  { %v75_v45 = vadd.f32 %v277_v40, %v74_v44  ;;  %v101_v13 = vmax.f32 %v90_v12, 0.0 }
  0xa9   :  { %v96_v47 = vmax.f32 %v75_v45, 0.0 }
  0xab   :  { %142 = vmatmul.f32.gmra.mxu1 %v96_v47 }
  0xac   :  { %v92_v50 = vpop.f32.mrf.mxu3 }
  0xad   :  { %v93_v52 = vadd.f32 %v277_v40, %v92_v50 }
  0xae   :  { %v77_v48 = vpop.f32.mrf.mxu0 }
  0xaf   :  { %v78_v49 = vadd.f32 %v277_v40, %v77_v48  ;;  %v102_v53 = vmax.f32 %v93_v52, 0.0 }
  0xb1   :  { %v97_v51 = vmax.f32 %v78_v49, 0.0  ;;  %160 = vmatmul.f32.vlgmr.msrb.gmra.mxu3 %v102_v53 }
  0xb3   :  { %145 = vmatmul.f32.gmra.mxu1 %v97_v51 }
  0xb6   :  { %v80_v57 = vpop.f32.mrf.mxu0 }
  0xb7   :  { %v81_v58 = vadd.f32 %v277_v40, %v80_v57 }
  0xb9   :  { %v98_v60 = vmax.f32 %v81_v58, 0.0 }
  0xbb   :  { %148 = vmatmul.f32.gmra.mxu1 %v98_v60 }
  0xbe   :  { %v83_v0 = vpop.f32.mrf.mxu0 }
  0xbf   :  { %v84_v1 = vadd.f32 %v277_v40, %v83_v0 }
  0xc1   :  { %v99_v3 = vmax.f32 %v84_v1, 0.0 }
  0xc3   :  { %151 = vmatmul.f32.gmra.mxu1 %v99_v3 }
  0xc6   :  { %v86_v7 = vpop.f32.mrf.mxu0 }
  0xc7   :  { %v87_v8 = vadd.f32 %v277_v40, %v86_v7 }
  0xc9   :  { %v100_v10 = vmax.f32 %v87_v8, 0.0 }
  0xcb   :  { %154 = vmatmul.f32.gmra.mxu1 %v100_v10 }
  0xd3   :  { %157 = vmatmul.f32.gmra.mxu1 %v101_v13 }
 0x120   :  { %v140_v18 = vpop.f32.mrf.mxu1 }
 0x121   :  { %v141_v19 = vadd.f32 %v278_v17, %v140_v18 }
 0x123   :  { %v164_v20 = vmax.f32 %v141_v19, 0.0 }
 0x125   :  { %208 = vmatmul.f32.vlgmr.msra.gmra.mxu2 %v164_v20 }
 0x128   :  { %v143_v21 = vpop.f32.mrf.mxu1 }
 0x129   :  { %v144_v22 = vadd.f32 %v278_v17, %v143_v21 }
 0x12b   :  { %v165_v23 = vmax.f32 %v144_v22, 0.0 }
 0x12d   :  { %211 = vmatmul.f32.gmra.mxu2 %v165_v23 }
 0x130   :  { %v146_v24 = vpop.f32.mrf.mxu1 }
 0x131   :  { %v147_v25 = vadd.f32 %v278_v17, %v146_v24 }
 0x133   :  { %v166_v26 = vmax.f32 %v147_v25, 0.0 }
 0x134   :  { %v161_v38 = vpop.f32.mrf.mxu3 }
 0x135   :  { %214 = vmatmul.f32.gmra.mxu2 %v166_v26  ;;  %v162_v40 = vadd.f32 %v278_v17, %v161_v38 }
 0x137   :  { %v171_v41 = vmax.f32 %v162_v40, 0.0 }
 0x138   :  { %v149_v27 = vpop.f32.mrf.mxu1 }
 0x139   :  { %v150_v28 = vadd.f32 %v278_v17, %v149_v27 }
 0x13b   :  { %v167_v29 = vmax.f32 %v150_v28, 0.0 }
 0x13d   :  { %217 = vmatmul.f32.gmra.mxu2 %v167_v29 }
 0x140   :  { %v152_v30 = vpop.f32.mrf.mxu1 }
 0x141   :  { %v153_v31 = vadd.f32 %v278_v17, %v152_v30 }
 0x143   :  { %v168_v32 = vmax.f32 %v153_v31, 0.0 }
 0x145   :  { %220 = vmatmul.f32.gmra.mxu2 %v168_v32 }
 0x148   :  { %v155_v33 = vpop.f32.mrf.mxu1 }
 0x149   :  { %v156_v34 = vadd.f32 %v278_v17, %v155_v33 }
 0x14b   :  { %v169_v35 = vmax.f32 %v156_v34, 0.0 }
 0x14d   :  { %223 = vmatmul.f32.gmra.mxu2 %v169_v35 }
 0x150   :  { %v158_v36 = vpop.f32.mrf.mxu1 }
 0x151   :  { %v159_v37 = vadd.f32 %v278_v17, %v158_v36 }
 0x153   :  { %v170_v39 = vmax.f32 %v159_v37, 0.0 }
 0x155   :  { %226 = vmatmul.f32.gmra.mxu2 %v170_v39 }
 0x15d   :  { %229 = vmatmul.f32.gmra.mxu2 %v171_v41 }
 0x1a8   :  { %v209_v43 = vpop.f32.mrf.mxu2 }
 0x1a9   :  { %v210_v44 = vadd.f32 %v279_v42, %v209_v43 }
 0x1ab   :  { %233 = vst [vmem:[%s528_s7] sm:$0xff] %v210_v44 }
 0x1b0   :  { %v212_v45 = vpop.f32.mrf.mxu2 }
 0x1b1   :  { %v213_v46 = vadd.f32 %v279_v42, %v212_v45 }
 0x1b3   :  { %234 = vst [vmem:[%s528_s7 + $0x8] sm:$0xff] %v213_v46 }
 0x1b8   :  { %v215_v47 = vpop.f32.mrf.mxu2 }
 0x1b9   :  { %v216_v48 = vadd.f32 %v279_v42, %v215_v47 }
 0x1bb   :  { %235 = vst [vmem:[%s528_s7 + $0x10] sm:$0xff] %v216_v48 }
 0x1c0   :  { %v218_v49 = vpop.f32.mrf.mxu2 }
 0x1c1   :  { %v219_v50 = vadd.f32 %v279_v42, %v218_v49 }
 0x1c3   :  { %236 = vst [vmem:[%s528_s7 + $0x18] sm:$0xff] %v219_v50 }
 0x1c8   :  { %v221_v51 = vpop.f32.mrf.mxu2 }
 0x1c9   :  { %v222_v52 = vadd.f32 %v279_v42, %v221_v51 }
 0x1cb   :  { %237 = vst [vmem:[%s528_s7 + $0x20] sm:$0xff] %v222_v52 }
 0x1d0   :  { %v224_v53 = vpop.f32.mrf.mxu2 }
 0x1d1   :  { %v225_v54 = vadd.f32 %v279_v42, %v224_v53 }
 0x1d3   :  { %238 = vst [vmem:[%s528_s7 + $0x28] sm:$0xff] %v225_v54 }
 0x1d8   :  { %v227_v55 = vpop.f32.mrf.mxu2 }
 0x1d9   :  { %v228_v56 = vadd.f32 %v279_v42, %v227_v55 }
 0x1db   :  { %239 = vst [vmem:[%s528_s7 + $0x30] sm:$0xff] %v228_v56 }
 0x1e0   :  { %v230_v57 = vpop.f32.mrf.mxu2 }
 0x1e1   :  { %v231_v58 = vadd.f32 %v279_v42, %v230_v57 }
 0x1e3   :  { %240 = vst [vmem:[%s528_s7 + $0x38] sm:$0xff] %v231_v58 }

</bundles_post_ra>
